<compile_context>
chip_gen: v7x
topology: tpu7x:2x2x1
jax: 0.10.0
libtpu: 0.0.40
codegen_flags: <defaults>
</compile_context>

<pallas_src>
import jax
import jax.numpy as jnp
from jax.experimental import pallas as pl
from jax.experimental.pallas import tpu as pltpu


def full4net_kernel(xt_ref, w1t_ref, b1_ref, w2t_ref, b2_ref, w3_ref, b3_ref, o_ref):
    # Transposed layout: activations are [hid, TM] (hid on sublanes, batch on lanes).
    x0 = xt_ref[0:1, :]                              # [1, TM]
    x1 = xt_ref[1:2, :]                              # [1, TM]

    # Layer 1 (in_hid, K=2): two VPU broadcast FMAs, no MXU.
    h1 = jnp.tanh(
        w1t_ref[:, 0:1] * x0 + w1t_ref[:, 1:2] * x1 + b1_ref[...]
    )                                                # [hid, TM]

    # Layers 2 & 3 (hid_hid applied twice, shared weights): MXU, f32 accumulation.
    w2t = w2t_ref[...]
    b2 = b2_ref[...]
    h2 = jnp.tanh(jnp.dot(w2t, h1, preferred_element_type=jnp.float32) + b2)  # [hid, TM]
    h3 = jnp.tanh(jnp.dot(w2t, h2, preferred_element_type=jnp.float32) + b2)  # [hid, TM]

    # Output layer (hid_out, N=1): VPU multiply + sublane reduction (XLU),
    # producing a lane-dense [1, TM] row.
    out_sum = jnp.sum(h3 * w3_ref[...], axis=0, keepdims=True) + b3_ref[...]  # [1, TM]
    o_ref[...] = jax.nn.sigmoid(out_sum)


def full4net_forward(x, w1, b1, w2, b2, w3, b3, *, tm=2048):
    """x: [N, 2]; w: [in_features, out_features]; b: [1, out_features] -> [N, 1]."""
    n = x.shape[0]
    hid = w1.shape[1]

    # Batch lives on the lane axis: pad N to a 128-aligned batch tile so the
    # grid divides exactly.  A large tile (tm=2048 -> ~28 KiB of streamed
    # blocks per step) amortises the ~0.35 us per-grid-step overhead while
    # staying far below the scoped-VMEM limit.
    n_lanes = ((n + 127) // 128) * 128
    tm = min(tm, n_lanes)
    n_pad = pl.cdiv(n_lanes, tm) * tm
    grid = (n_pad // tm,)

    # Transposed operands (pure layout plumbing, done once outside the kernel).
    xt = jnp.zeros((2, n_pad), jnp.float32).at[:, :n].set(x.T)
    w1t = w1.T                      # [hid, 2]
    b1c = b1.reshape(hid, 1)        # [hid, 1]
    w2t = w2.T                      # [hid, hid]
    b2c = b2.reshape(hid, 1)        # [hid, 1]
    w3c = w3.reshape(hid, 1)        # [hid, 1]
    b3c = b3.reshape(1, 1)          # [1, 1]

    resident = lambda shape: pl.BlockSpec(shape, lambda i: (0, 0))

    out = pl.pallas_call(
        full4net_kernel,
        out_shape=jax.ShapeDtypeStruct((1, n_pad), jnp.float32),
        grid=grid,
        in_specs=[
            pl.BlockSpec((2, tm), lambda i: (0, i)),       # x^T   (streamed per tile)
            resident((hid, 2)),                            # W1^T  (VMEM-resident)
            resident((hid, 1)),                            # b1
            resident((hid, hid)),                          # W2^T  (reused twice)
            resident((hid, 1)),                            # b2
            resident((hid, 1)),                            # W3 column
            resident((1, 1)),                              # b3
        ],
        out_specs=pl.BlockSpec((1, tm), lambda i: (0, i)),  # lane-dense output row
        compiler_params=pltpu.CompilerParams(
            dimension_semantics=("parallel",),
            vmem_limit_bytes=32 * 1024 * 1024,
        ),
    )(xt, w1t, b1c, w2t, b2c, w3c, b3c)

    return out[0, :n].reshape(n, 1)


def init_params(hid, key):
    """Deterministic init mimicking torch.nn.Linear default U(-1/sqrt(fan_in), 1/sqrt(fan_in))."""
    ks = jax.random.split(key, 6)

    def lin(kw, kb, fan_in, fan_out):
        bound = 1.0 / jnp.sqrt(fan_in)
        w = jax.random.uniform(kw, (fan_in, fan_out), jnp.float32, -bound, bound)
        b = jax.random.uniform(kb, (1, fan_out), jnp.float32, -bound, bound)
        return w, b

    w1, b1 = lin(ks[0], ks[1], 2, hid)       # in_hid
    w2, b2 = lin(ks[2], ks[3], hid, hid)     # hid_hid (used twice)
    w3, b3 = lin(ks[4], ks[5], hid, 1)       # hid_out
    return w1, b1, w2, b2, w3, b3


def reference_forward(x, w1, b1, w2, b2, w3, b3):
    h1 = jnp.tanh(x @ w1 + b1)
    h2 = jnp.tanh(h1 @ w2 + b2)
    h3 = jnp.tanh(h2 @ w2 + b2)
    return jax.nn.sigmoid(h3 @ w3 + b3)


if __name__ == "__main__":
    key = jax.random.PRNGKey(0)
    k_x, k_p = jax.random.split(key)

    batch, hid = 8, 32
    x = jax.random.normal(k_x, (batch, 2), dtype=jnp.float32)
    params = init_params(hid, k_p)

    out = full4net_forward(x, *params)
    out = jax.block_until_ready(out)

    ref = reference_forward(x, *params)
    assert out.shape == (batch, 1)
    assert jnp.allclose(out, ref, atol=1e-5, rtol=1e-5)

    print("KERNEL_OK")
</pallas_src>

<mosaic_0001>
module attributes {stable_mosaic.version = 11 : i64} {
  func.func @full4net_kernel(%arg0: i32, %arg1: memref<2x128xf32, #tpu.memory_space<vmem>>, %arg2: memref<32x2xf32, #tpu.memory_space<vmem>>, %arg3: memref<32x1xf32, #tpu.memory_space<vmem>>, %arg4: memref<32x32xf32, #tpu.memory_space<vmem>>, %arg5: memref<32x1xf32, #tpu.memory_space<vmem>>, %arg6: memref<32x1xf32, #tpu.memory_space<vmem>>, %arg7: memref<1x1xf32, #tpu.memory_space<vmem>>, %arg8: memref<1x128xf32, #tpu.memory_space<vmem>>) attributes {dimension_semantics = [#tpu.dimension_semantics<parallel>], iteration_bounds = array<i64: 1>, scalar_prefetch = 0 : i64, scratch_operands = 0 : i64, tpu.core_type = #tpu.core_type<tc>, window_params = [{transform_indices = @transform_0, window_bounds = array<i64: 2, 128>}, {pipeline_mode = #tpu.pipeline_mode<synchronous>, transform_indices = @transform_1, window_bounds = array<i64: 32, 2>}, {pipeline_mode = #tpu.pipeline_mode<synchronous>, transform_indices = @transform_2, window_bounds = array<i64: 32, 1>}, {pipeline_mode = #tpu.pipeline_mode<synchronous>, transform_indices = @transform_3, window_bounds = array<i64: 32, 32>}, {pipeline_mode = #tpu.pipeline_mode<synchronous>, transform_indices = @transform_4, window_bounds = array<i64: 32, 1>}, {pipeline_mode = #tpu.pipeline_mode<synchronous>, transform_indices = @transform_5, window_bounds = array<i64: 32, 1>}, {pipeline_mode = #tpu.pipeline_mode<synchronous>, transform_indices = @transform_6, window_bounds = array<i64: 1, 1>}, {transform_indices = @transform_7, window_bounds = array<i64: 1, 128>}]} {
    %c0 = arith.constant 0 : index
    %c0_0 = arith.constant 0 : index
    %0 = vector.load %arg1[%c0, %c0_0] : memref<2x128xf32, #tpu.memory_space<vmem>>, vector<1x128xf32>
    %c1 = arith.constant 1 : index
    %c0_1 = arith.constant 0 : index
    %1 = vector.load %arg1[%c1, %c0_1] : memref<2x128xf32, #tpu.memory_space<vmem>>, vector<1x128xf32>
    %c0_2 = arith.constant 0 : index
    %c0_3 = arith.constant 0 : index
    %2 = vector.load %arg2[%c0_2, %c0_3] : memref<32x2xf32, #tpu.memory_space<vmem>>, vector<32x1xf32>
    %3 = vector.broadcast %2 : vector<32x1xf32> to vector<32x128xf32>
    %4 = vector.broadcast %0 : vector<1x128xf32> to vector<32x128xf32>
    %5 = arith.mulf %3, %4 : vector<32x128xf32>
    %c0_4 = arith.constant 0 : index
    %c1_5 = arith.constant 1 : index
    %6 = vector.load %arg2[%c0_4, %c1_5] : memref<32x2xf32, #tpu.memory_space<vmem>>, vector<32x1xf32>
    %7 = vector.broadcast %6 : vector<32x1xf32> to vector<32x128xf32>
    %8 = vector.broadcast %1 : vector<1x128xf32> to vector<32x128xf32>
    %9 = arith.mulf %7, %8 : vector<32x128xf32>
    %10 = arith.addf %5, %9 : vector<32x128xf32>
    %c0_6 = arith.constant 0 : index
    %c0_7 = arith.constant 0 : index
    %11 = vector.load %arg3[%c0_6, %c0_7] : memref<32x1xf32, #tpu.memory_space<vmem>>, vector<32x1xf32>
    %12 = vector.broadcast %11 : vector<32x1xf32> to vector<32x128xf32>
    %13 = arith.addf %10, %12 : vector<32x128xf32>
    %14 = math.tanh %13 : vector<32x128xf32>
    %c0_8 = arith.constant 0 : index
    %c0_9 = arith.constant 0 : index
    %15 = vector.load %arg4[%c0_8, %c0_9] : memref<32x32xf32, #tpu.memory_space<vmem>>, vector<32x32xf32>
    %c0_10 = arith.constant 0 : index
    %c0_11 = arith.constant 0 : index
    %16 = vector.load %arg5[%c0_10, %c0_11] : memref<32x1xf32, #tpu.memory_space<vmem>>, vector<32x1xf32>
    %cst = arith.constant dense<0.000000e+00> : vector<32x128xf32>
    %17 = tpu.matmul %15, %14, %cst {dimension_numbers = #tpu.dot_dimension_numbers<[1], [0], [0], [1], [0, 0, 1, 1], [], []>} : vector<32x32xf32>, vector<32x128xf32>, vector<32x128xf32> -> vector<32x128xf32>
    %18 = vector.broadcast %16 : vector<32x1xf32> to vector<32x128xf32>
    %19 = arith.addf %17, %18 : vector<32x128xf32>
    %20 = math.tanh %19 : vector<32x128xf32>
    %cst_12 = arith.constant dense<0.000000e+00> : vector<32x128xf32>
    %21 = tpu.matmul %15, %20, %cst_12 {dimension_numbers = #tpu.dot_dimension_numbers<[1], [0], [0], [1], [0, 0, 1, 1], [], []>} : vector<32x32xf32>, vector<32x128xf32>, vector<32x128xf32> -> vector<32x128xf32>
    %22 = vector.broadcast %16 : vector<32x1xf32> to vector<32x128xf32>
    %23 = arith.addf %21, %22 : vector<32x128xf32>
    %24 = math.tanh %23 : vector<32x128xf32>
    %c0_13 = arith.constant 0 : index
    %c0_14 = arith.constant 0 : index
    %25 = vector.load %arg6[%c0_13, %c0_14] : memref<32x1xf32, #tpu.memory_space<vmem>>, vector<32x1xf32>
    %26 = vector.broadcast %25 : vector<32x1xf32> to vector<32x128xf32>
    %27 = arith.mulf %24, %26 : vector<32x128xf32>
    %cst_15 = arith.constant dense<0.000000e+00> : vector<128xf32>
    %28 = vector.multi_reduction <add>, %27, %cst_15 [0] : vector<32x128xf32> to vector<128xf32>
    %29 = vector.shape_cast %28 : vector<128xf32> to vector<1x128xf32>
    %c0_16 = arith.constant 0 : index
    %c0_17 = arith.constant 0 : index
    %30 = vector.load %arg7[%c0_16, %c0_17] : memref<1x1xf32, #tpu.memory_space<vmem>>, vector<1x1xf32>
    %31 = vector.broadcast %30 : vector<1x1xf32> to vector<1x128xf32>
    %32 = arith.addf %29, %31 : vector<1x128xf32>
    %33 = arith.negf %32 : vector<1x128xf32>
    %34 = math.exp %33 : vector<1x128xf32>
    %cst_18 = arith.constant 1.000000e+00 : f32
    %35 = vector.broadcast %cst_18 : f32 to vector<1x128xf32>
    %36 = arith.addf %35, %34 : vector<1x128xf32>
    %37 = arith.divf %35, %36 : vector<1x128xf32>
    %c0_19 = arith.constant 0 : index
    %c0_20 = arith.constant 0 : index
    %38 = vector.load %arg8[%c0_19, %c0_20] : memref<1x128xf32, #tpu.memory_space<vmem>>, vector<1x128xf32>
    tpu.vector_store %arg8[%c0_19, %c0_20], %37 {strides = array<i32>} : memref<1x128xf32, #tpu.memory_space<vmem>>, vector<1x128xf32>,
    return
  }
  func.func @transform_0(%arg0: i32) -> (i32, i32) {
    %c0_i32 = arith.constant 0 : i32
    %c0_i32_0 = arith.constant 0 : i32
    return %c0_i32, %arg0 : i32, i32
  }
  func.func @transform_1(%arg0: i32) -> (i32, i32) {
    %c0_i32 = arith.constant 0 : i32
    %c0_i32_0 = arith.constant 0 : i32
    %c0_i32_1 = arith.constant 0 : i32
    return %c0_i32, %c0_i32_0 : i32, i32
  }
  func.func @transform_2(%arg0: i32) -> (i32, i32) {
    %c0_i32 = arith.constant 0 : i32
    %c0_i32_0 = arith.constant 0 : i32
    %c0_i32_1 = arith.constant 0 : i32
    return %c0_i32, %c0_i32_0 : i32, i32
  }
  func.func @transform_3(%arg0: i32) -> (i32, i32) {
    %c0_i32 = arith.constant 0 : i32
    %c0_i32_0 = arith.constant 0 : i32
    %c0_i32_1 = arith.constant 0 : i32
    return %c0_i32, %c0_i32_0 : i32, i32
  }
  func.func @transform_4(%arg0: i32) -> (i32, i32) {
    %c0_i32 = arith.constant 0 : i32
    %c0_i32_0 = arith.constant 0 : i32
    %c0_i32_1 = arith.constant 0 : i32
    return %c0_i32, %c0_i32_0 : i32, i32
  }
  func.func @transform_5(%arg0: i32) -> (i32, i32) {
    %c0_i32 = arith.constant 0 : i32
    %c0_i32_0 = arith.constant 0 : i32
    %c0_i32_1 = arith.constant 0 : i32
    return %c0_i32, %c0_i32_0 : i32, i32
  }
  func.func @transform_6(%arg0: i32) -> (i32, i32) {
    %c0_i32 = arith.constant 0 : i32
    %c0_i32_0 = arith.constant 0 : i32
    %c0_i32_1 = arith.constant 0 : i32
    return %c0_i32, %c0_i32_0 : i32, i32
  }
  func.func @transform_7(%arg0: i32) -> (i32, i32) {
    %c0_i32 = arith.constant 0 : i32
    %c0_i32_0 = arith.constant 0 : i32
    return %c0_i32, %arg0 : i32, i32
  }
}

</mosaic_0001>

<bundles_post_ra>
// kernel: tpu_custom_call.1
= control target key start
LH: loop header
LB: loop body
LE: loop exit
PB: predicated region body
PF: predicated region fallthrough
CT: control target
= control target key end

     0   :  { %s675_s0 = inlined_call_operand.vmem [shape: f32[2,128], index: 0, kind: input, shape index: {}]   ;;  %s676_s1 = inlined_call_operand.vmem [shape: f32[32,2], index: 1, kind: input, shape index: {}]   ;;  %s677_s2 = inlined_call_operand.vmem [shape: f32[32,1], index: 2, kind: input, shape index: {}]   ;;  %s678_s3 = inlined_call_operand.vmem [shape: f32[32,32], index: 3, kind: input, shape index: {}]   ;;  %s679_s4 = inlined_call_operand.vmem [shape: f32[32,1], index: 4, kind: input, shape index: {}]   ;;  %s680_s5 = inlined_call_operand.vmem [shape: f32[32,1], index: 5, kind: input, shape index: {}]   ;;  %s681_s6 = inlined_call_operand.<no memory space> [shape: f32[1,1], index: 6, kind: input, shape index: {}]   ;;  %s682_s7 = inlined_call_operand.hbm [shape: f32[1,128], index: 7, kind: output, shape index: {}]  }
   0x1   :  { %v12_v0 = vstv %s681_s6 }
   0x2   :  { %13 = vst [vmem:[#allocation2] sm:$0x1] %v12_v0 }
   0x3   :  { %v33_v1 = vld [vmem:[%s676_s1 + $0x10] sm:$0xff]  ;;  %v31_v2 = vld [vmem:[%s676_s1] sm:$0xff]  ;;  %v543_v3 = vmov 1   ;;  %v32_v4 = vld [vmem:[%s676_s1 + $0x8] sm:$0xff]  ;;  %v544_v5 = vmov 0  }
   0x4   :  { %487 = vset.pattern.permute.xlu0 %v543_v3  ;;  %485 = vset.pattern.permute.xlu1 %v543_v3 }
   0x5   :  { %72 = vperm.xlu0 %487, %v33_v1   ;;  %64 = vperm.xlu1 %485, %v31_v2  }
   0x9   :  { %488 = vset.pattern.permute.xlu0 %v544_v5  ;;  %68 = vperm.xlu1 %485, %v32_v4  }
   0xa   :  { %14 = vsyncpa [#allocation4], 0  ;;  %37 = vperm.xlu0 %488, %v31_v2   ;;  %v34_v6 = vld [vmem:[%s676_s1 + $0x18] sm:$0xff]  ;;  %v92_v7 = vld [vmem:[%s677_s2 + $0x8] sm:$0xff]  ;;  %vm151_vm0 = vcmask 261120  }
   0xb   :  { %v91_v8 = vld [vmem:[%s677_s2] sm:$0xff]  ;;  %v93_v10 = vld [vmem:[%s677_s2 + $0x10] sm:$0xff]  ;;  %v94_v12 = vld [vmem:[%s677_s2 + $0x18] sm:$0xff] }
   0xc   :  { %v127_v9 = vld [vmem:[%s679_s4] sm:$0xff]  ;;  %v129_v11 = vld [vmem:[%s679_s4 + $0x10] sm:$0xff]  ;;  %v128_v14 = vld [vmem:[%s679_s4 + $0x8] sm:$0xff] }
   0xd   :  { %486 = vset.pattern.permute.xlu1 %v544_v5  ;;  %v342_v13 = vld [vmem:[%s680_s5] sm:$0xff]  ;;  %v344_v15 = vld [vmem:[%s680_s5 + $0x10] sm:$0xff]  ;;  %v130_v16 = vld [vmem:[%s679_s4 + $0x18] sm:$0xff] }
   0xe   :  { %42 = vperm.xlu0 %488, %v32_v4   ;;  %52 = vperm.xlu1 %486, %v34_v6   ;;  %v379_v17 = vld [vmem:[#allocation2] sm:$0x1]  ;;  %v343_v18 = vld [vmem:[%s680_s5 + $0x8] sm:$0xff]  ;;  %v345_v19 = vld [vmem:[%s680_s5 + $0x18] sm:$0xff] }
   0xf   :  { %v123_v20 = vld [vmem:[%s678_s3] sm:$0xff]  ;;  %v124_v57 = vld [vmem:[%s678_s3 + $0x8] sm:$0xff]  ;;  %v125_v58 = vld [vmem:[%s678_s3 + $0x10] sm:$0xff] }
  0x10   :  { %446 = vmatprep.mubr.msk.f32.mxu0 %vm151_vm0, %v123_v20  ;;  %460 = vmatprep.mubr.msk.f32.mxu1 %vm151_vm0, %v123_v20  ;;  %v411_v27 = vld [vmem:[%s675_s0] ss:$0 sm:$0xff]  ;;  %v412_v29 = vld [vmem:[%s675_s0 + $0x1] ss:$0 sm:$0xff]  ;;  %v126_v59 = vld [vmem:[%s678_s3 + $0x18] sm:$0xff]  ;;  %s545_s3 = smov [#allocation3]  }
  0x11   :  { %s403_s16 = sshll.u32 %s545_s3, 4  ;;  %s404_s16 = int_to_ptr.vmem [resolvable:$true] %s403_s16 }
  0x12   :  { %47 = vperm.xlu0 %488, %v33_v1   ;;  %489 = vset.pattern.permute.xlu1 %v543_v3  ;;  %s519_s17 = scalar_lea.vmem %s404_s16, 16  ;;  %s523_s18 = scalar_lea.vmem %s404_s16, 32 }
  0x13   :  { %76 = vperm.xlu1 %489, %v34_v6   ;;  %p520_p0 = scmp.ne.s32.totalorder %s404_s16, %s519_s17  ;;  %p524_p1 = scmp.lt.s32.totalorder %s404_s16, %s404_s16 }
  0x14   :  { %p525_p2 = scmp.lt.s32.totalorder %s523_s18, %s519_s17 }
  0x16   :  { %102 = vperm.xlu0 %488, %v92_v7   ;;  %p526_p3 = por %p525_p2, %p524_p1 }
  0x17   :  { %490 = vset.pattern.permute.xlu1 %v544_v5 }
  0x18   :  { %97 = vperm.xlu1 %490, %v91_v8   ;;  %p527_p4 = pnand %p526_p3, %p520_p0 }
  0x1a   :  { %133 = vperm.xlu0 %488, %v127_v9  }
  0x1c   :  { %107 = vperm.xlu1 %490, %v93_v10  }
  0x1e   :  { %143 = vperm.xlu0 %488, %v129_v11  }
  0x20   :  { %112 = vperm.xlu1 %490, %v94_v12  }
  0x22   :  { %348 = vperm.xlu0 %488, %v342_v13  }
  0x24   :  { %138 = vperm.xlu1 %490, %v128_v14  }
  0x26   :  { %358 = vperm.xlu0 %488, %v344_v15  }
  0x28   :  { %148 = vperm.xlu1 %490, %v130_v16  }
  0x2a   :  { %382 = vperm.xlu0 %488, %v379_v17  }
  0x2c   :  { %353 = vperm.xlu1 %490, %v343_v18  }
  0x30   :  { %363 = vperm.xlu1 %490, %v345_v19  }
  0x84   :  { %v65_v21 = vpop.permute.xlu1 %64  ;;  %v73_v22 = vpop.permute.xlu0 %72 }
  0x85   :  { %v83_v34 = vmul.f32 %v412_v29, %v65_v21  ;;  %v85_v42 = vmul.f32 %v412_v29, %v73_v22 }
  0x88   :  { %v69_v23 = vpop.permute.xlu1 %68 }
  0x89   :  { %v38_v24 = vpop.permute.xlu0 %37  ;;  %v84_v31 = vmul.f32 %v412_v29, %v69_v23 }
  0x8a   :  { %v59_v32 = vmul.f32 %v411_v27, %v38_v24 }
  0x8c   :  { %v87_v38 = vadd.f32 %v83_v34, %v59_v32 }
  0x8d   :  { %v43_v25 = vpop.permute.xlu0 %42  ;;  %v53_v26 = vpop.permute.xlu1 %52 }
  0x8e   :  { %v60_v28 = vmul.f32 %v411_v27, %v43_v25  ;;  %v62_v46 = vmul.f32 %v411_v27, %v53_v26 }
  0x90   :  { %v88_v35 = vadd.f32 %v84_v31, %v60_v28 }
  0x91   :  { %v48_v30 = vpop.permute.xlu0 %47 }
  0x92   :  { %v77_v33 = vpop.permute.xlu1 %76  ;;  %v61_v39 = vmul.f32 %v411_v27, %v48_v30 }
  0x93   :  { %v86_v43 = vmul.f32 %v412_v29, %v77_v33 }
  0x94   :  { %v89_v45 = vadd.f32 %v85_v42, %v61_v39 }
  0x95   :  { %v103_v36 = vpop.permute.xlu0 %102  ;;  %v90_v48 = vadd.f32 %v86_v43, %v62_v46 }
  0x96   :  { %v116_v37 = vadd.f32 %v103_v36, %v88_v35  ;;  %v385_v36 = vlaneseq }
  0x97   :  { %v98_v40 = vpop.permute.xlu1 %97 }
  0x98   :  { %v115_v41 = vadd.f32 %v98_v40, %v87_v38  ;;  %491 = vtanh.f32 %v116_v37  ;;  %v386_v39 = vshrl.u32 %v385_v36, 7 }
  0x99   :  { %v134_v61 = vpop.permute.xlu0 %133 }
  0x9a   :  { %493 = vtanh.f32 %v115_v41  ;;  %v387_v42 = vsub.s32 0, %v386_v39 }
  0x9b   :  { %v108_v44 = vpop.permute.xlu1 %107 }
  0x9c   :  { %v117_v47 = vadd.f32 %v108_v44, %v89_v45 }
  0x9d   :  { %v144_v4 = vpop.permute.xlu0 %143 }
  0x9e   :  { %495 = vtanh.f32 %v117_v47 }
  0x9f   :  { %v113_v49 = vpop.permute.xlu1 %112 }
  0xa0   :  { %v118_v50 = vadd.f32 %v113_v49, %v90_v48 }
  0xa1   :  { %v349_v22 = vpop.permute.xlu0 %348 }
  0xa2   :  { %497 = vtanh.f32 %v118_v50  ;;  %v492_v51 = vpop.eup %491 }
  0xa3   :  { %v139_v60 = vpop.permute.xlu1 %138 }
  0xa4   :  { %v494_v52 = vpop.eup %493 }
  0xa5   :  { %v466_v53 = vpack.c.bf16 %v492_v51, %v494_v52  ;;  %v359_v31 = vpop.permute.xlu0 %358 }
  0xa7   :  { %467 = vmatprep.subr.bf16.mxu0 %v466_v53  ;;  %v149_v2 = vpop.permute.xlu1 %148 }
  0xa8   :  { %469 = vmatpush3.bf16.msra.mxu0 %v466_v53  ;;  %v496_v54 = vpop.eup %495 }
  0xa9   :  { %v383_v44 = vpop.permute.xlu0 %382 }
  0xaa   :  { %v388_v46 = vrot.slane %v383_v44, %v387_v42 }
  0xab   :  { %v354_v24 = vpop.permute.xlu1 %353 }
  0xac   :  { %v498_v55 = vpop.eup %497 }
  0xad   :  { %v470_v56 = vpack.c.bf16 %v498_v55, %v496_v54 }
  0xaf   :  { %471 = vmatprep.subr.bf16.mxu0 %v470_v56  ;;  %v364_v33 = vpop.permute.xlu1 %363 }
  0xb0   :  { %473 = vmatpush3.bf16.msra.mxu0 %v470_v56 }
  0xb3   :  { %447 = vmatmul.mubr.msk.f32.vlgmr.msra.gmra.mrb[0].mxu0 %vm151_vm0, %v124_v57 }
  0xb4   :  { %449 = vmatprep.mubr.msk.f32.mxu0 %vm151_vm0, %v125_v58 }
  0xb7   :  { %450 = vmatmul.mubr.msk.f32.gmra.mrb[2].mxu0 %vm151_vm0, %v126_v59 }
 0x186   :  { %v448_v62 = vpop.f32.mrb[0].mxu0 }
 0x187   :  { %v236_v63 = vadd.f32 %v448_v62, %v139_v60  ;;  %v230_v0 = vpop.f32.mrb[1].mxu0 }
 0x188   :  { %v231_v1 = vadd.f32 %v230_v0, %v134_v61 }
 0x189   :  { %499 = vtanh.f32 %v236_v63 }
 0x18a   :  { %501 = vtanh.f32 %v231_v1  ;;  %v451_v3 = vpop.f32.mrb[2].mxu0 }
 0x18b   :  { %v246_v5 = vadd.f32 %v451_v3, %v149_v2  ;;  %v240_v6 = vpop.f32.mrb[3].mxu0 }
 0x18c   :  { %v241_v7 = vadd.f32 %v240_v6, %v144_v4 }
 0x18d   :  { %503 = vtanh.f32 %v246_v5 }
 0x18e   :  { %505 = vtanh.f32 %v241_v7 }
 0x193   :  { %v500_v8 = vpop.eup %499 }
 0x194   :  { %v502_v9 = vpop.eup %501 }
 0x195   :  { %v474_v10 = vpack.c.bf16 %v500_v8, %v502_v9 }
 0x197   :  { %v504_v11 = vpop.eup %503  ;;  %475 = vmatprep.subr.bf16.mxu1 %v474_v10 }
 0x198   :  { %v506_v12 = vpop.eup %505  ;;  %477 = vmatpush3.bf16.msra.mxu1 %v474_v10 }
 0x199   :  { %v478_v13 = vpack.c.bf16 %v504_v11, %v506_v12 }
 0x19b   :  { %479 = vmatprep.subr.bf16.mxu1 %v478_v13 }
 0x19c   :  { %481 = vmatpush3.bf16.msra.mxu1 %v478_v13 }
 0x19f   :  { %461 = vmatmul.mubr.msk.f32.vlgmr.msra.gmra.mrb[0].mxu1 %vm151_vm0, %v124_v57 }
 0x1a0   :  { %463 = vmatprep.mubr.msk.f32.mxu1 %vm151_vm0, %v125_v58 }
 0x1a3   :  { %464 = vmatmul.mubr.msk.f32.gmra.mrb[2].mxu1 %vm151_vm0, %v126_v59 }
 0x272   :  { %v462_v14 = vpop.f32.mrb[0].mxu1 }
 0x273   :  { %v325_v15 = vadd.f32 %v462_v14, %v139_v60  ;;  %v319_v16 = vpop.f32.mrb[1].mxu1 }
 0x274   :  { %v320_v17 = vadd.f32 %v319_v16, %v134_v61 }
 0x275   :  { %507 = vtanh.f32 %v325_v15 }
 0x276   :  { %509 = vtanh.f32 %v320_v17  ;;  %v465_v18 = vpop.f32.mrb[2].mxu1 }
 0x277   :  { %v335_v19 = vadd.f32 %v465_v18, %v149_v2  ;;  %v329_v20 = vpop.f32.mrb[3].mxu1 }
 0x278   :  { %v330_v21 = vadd.f32 %v329_v20, %v144_v4 }
 0x279   :  { %511 = vtanh.f32 %v335_v19 }
 0x27a   :  { %513 = vtanh.f32 %v330_v21 }
 0x27f   :  { %v508_v23 = vpop.eup %507 }
 0x280   :  { %v510_v25 = vpop.eup %509  ;;  %v367_v26 = vmul.f32 %v508_v23, %v354_v24 }
 0x281   :  { %v366_v27 = vmul.f32 %v510_v25, %v349_v22 }
 0x283   :  { %v512_v28 = vpop.eup %511  ;;  %v370_v29 = vadd.f32 %v367_v26, %v366_v27 }
 0x284   :  { %v514_v30 = vpop.eup %513  ;;  %v369_v34 = vmul.f32 %v512_v28, %v364_v33 }
 0x285   :  { %v368_v32 = vmul.f32 %v514_v30, %v359_v31 }
 0x287   :  { %v371_v35 = vadd.f32 %v370_v29, %v368_v32 }
 0x289   :  { %v372_v37 = vadd.f32 %v371_v35, %v369_v34 }
 0x28b   :  { %v373_v38 = vrot.slane %v372_v37, 4 }
 0x28d   :  { %v374_v40 = vadd.f32 %v373_v38, %v372_v37 }
 0x28f   :  { %v375_v41 = vrot.slane %v374_v40, 2 }
 0x291   :  { %v376_v43 = vadd.f32 %v375_v41, %v374_v40 }
 0x293   :  { %v377_v45 = vrot.slane %v376_v43, 1 }
 0x295   :  { %v378_v47 = vadd.f32 %v377_v45, %v376_v43 }
 0x297   :  { %v389_v48 = vadd.f32 %v388_v46, %v378_v47 }
 0x299   :  { %v421_v49 = vmul.f32 -1.442695, %v389_v48 }
 0x29b   :  { %515 = vpow2.f32 %v421_v49 }
 0x2a5   :  { %v516_v50 = vpop.eup %515 }
 0x2a6   :  { %v393_v51 = vadd.f32 1.0, %v516_v50 }
 0x2a8   :  { %517 = vrcp.f32 %v393_v51 }
 0x2b2   :  { %v518_v52 = vpop.eup %517 }
 0x2b3   :  { %396 = vst [vmem:[#allocation3] sm:$0x1] %v518_v52 }
 0x2b4   :  { %530 = shalt.err (!%p527_p4)
}
 0x2b5   :  { %s531_s21 = scalar_lea.hbm %s682_s7, 16 }
 0x2b6   :  { %p532_p5 = scmp.ne.s32.totalorder %s682_s7, %s531_s21  ;;  %p535_p6 = scmp.lt.u32.totalorder %s531_s21, %s682_s7 }
 0x2b8   :  { %p537_p7 = pnand %p535_p6, %p532_p5 }
 0x2ba   :  { %540 = shalt.err (!%p537_p7)
}
 0x2bb   :  { %406 = dma.vmem_to_hbm [thread:$0]  %s404_s16, 16, %s682_s7, [#allocation4]  }
 0x2bc   :  { %541 = dma.done.wait [#allocation4], 16  }
 0x2bd   :  { %542 = vsyncadd [#allocation4], 4294967280 }
 0x2be   :  { %410 = vsyncpa [#allocation4], 1 }

</bundles_post_ra>
